<compile_context>
chip_gen: v7x
topology: tpu7x:2x2x1
jax: 0.10.0
libtpu: 0.0.40
codegen_flags: <defaults>
</compile_context>

<pallas_src>
import jax
import jax.numpy as jnp
from jax.experimental import pallas as pl
from jax.experimental.pallas import tpu as pltpu

# ---- module sizes (from SimplePolicy.__init__) ------------------------------
S_SIZE = 1659
H_SIZE = 5
A_SIZE = 8

# ---- padded (tile-aligned) sizes --------------------------------------------
S_PAD = 1664   # 13 * 128 (lane axis of W1, feature axis of x)
H_PAD = 8      # one sublane per hidden unit (natural f32 sublane tile)
A_PAD = 128    # one lane per action

_NEG = -1e30   # effectively -inf for masked (padded) action lanes


def _policy_kernel(x_ref, w1_ref, b1_ref, w2_ref, b2_ref, logp_ref):
    # x_ref : (1, S_PAD)       state, features on lanes
    # w1_ref: (H_PAD, S_PAD)   hidden units on sublanes, features on lanes (== torch (out,in))
    # b1_ref: (H_PAD, 1)
    # w2_ref: (H_PAD, A_PAD)   hidden on sublanes, actions on lanes (== torch weight.T)
    # b2_ref: (1, A_PAD)
    x = x_ref[...]                                                     # (1, S_PAD)

    # Layer 1: per-hidden-unit dot product = VPU multiply + XLU lane reduce.
    h = jnp.sum(w1_ref[...] * x, axis=-1, keepdims=True) + b1_ref[...]  # (H_PAD, 1)
    h = jnp.maximum(h, 0.0)

    # Layer 2: broadcast over action lanes + sublane reduce -> logits (1, A_PAD).
    logits = jnp.sum(h * w2_ref[...], axis=0, keepdims=True) + b2_ref[...]

    # Log-softmax over the first A_SIZE lanes (dim=0 of the 1-D torch tensor).
    lane = jax.lax.broadcasted_iota(jnp.int32, logits.shape, 1)
    masked = jnp.where(lane < A_SIZE, logits, _NEG)
    m = jnp.max(masked, axis=-1, keepdims=True)
    # exp(-1e30 - m) underflows to exactly 0, so no extra masking needed here.
    denom = jnp.sum(jnp.exp(masked - m), axis=-1, keepdims=True)
    logp_ref[...] = (masked - m) - jnp.log(denom)


def _policy_logp(x_pad, w1, b1, w2, b2):
    vmem = pl.BlockSpec(memory_space=pltpu.MemorySpace.VMEM)
    return pl.pallas_call(
        _policy_kernel,
        out_shape=jax.ShapeDtypeStruct((1, A_PAD), jnp.float32),
        in_specs=[vmem] * 5,
        out_specs=vmem,
    )(x_pad, w1, b1, w2, b2)


def init_params(key):
    """Deterministic PyTorch-Linear-style init (uniform +-1/sqrt(fan_in)),
    stored in the lane-dense padded layouts the kernel expects."""
    k1, k2, k3, k4 = jax.random.split(key, 4)

    bound1 = 1.0 / jnp.sqrt(jnp.float32(S_SIZE))
    w1_real = jax.random.uniform(k1, (H_SIZE, S_SIZE), jnp.float32, -bound1, bound1)
    b1_real = jax.random.uniform(k2, (H_SIZE,), jnp.float32, -bound1, bound1)

    bound2 = 1.0 / jnp.sqrt(jnp.float32(H_SIZE))
    w2_real = jax.random.uniform(k3, (A_SIZE, H_SIZE), jnp.float32, -bound2, bound2)
    b2_real = jax.random.uniform(k4, (A_SIZE,), jnp.float32, -bound2, bound2)

    w1 = jnp.zeros((H_PAD, S_PAD), jnp.float32).at[:H_SIZE, :S_SIZE].set(w1_real)
    b1 = jnp.zeros((H_PAD, 1), jnp.float32).at[:H_SIZE, 0].set(b1_real)
    w2 = jnp.zeros((H_PAD, A_PAD), jnp.float32).at[:H_SIZE, :A_SIZE].set(w2_real.T)
    b2 = jnp.zeros((1, A_PAD), jnp.float32).at[0, :A_SIZE].set(b2_real)
    return w1, b1, w2, b2


@jax.jit
def simple_policy_forward(x, params, sample_key):
    """x: (S_SIZE,) float state vector. Returns (act, log_prob_of_act, probs)."""
    w1, b1, w2, b2 = params
    x = x.astype(jnp.float32)
    x_pad = jnp.zeros((1, S_PAD), jnp.float32).at[0, :S_SIZE].set(x)

    logp = _policy_logp(x_pad, w1, b1, w2, b2)[0, :A_SIZE]   # (A_SIZE,) == log(probs)
    probs = jnp.exp(logp)

    # TODO(synk): torch code uses np.random.choice (host-side numpy RNG); here we
    # sample the categorical with jax.random for a deterministic in-script run.
    act = jax.random.categorical(sample_key, logp)
    return act, logp[act], probs


if __name__ == "__main__":
    key = jax.random.PRNGKey(0)
    pkey, xkey, skey = jax.random.split(key, 3)

    params = init_params(pkey)
    x = jax.random.normal(xkey, (S_SIZE,), jnp.float32)

    act, log_prob, probs = simple_policy_forward(x, params, skey)
    act = jax.block_until_ready(act)
    log_prob = jax.block_until_ready(log_prob)
    probs = jax.block_until_ready(probs)

    # sanity: probs must be a valid distribution and log_prob consistent with it
    assert probs.shape == (A_SIZE,)
    assert abs(float(jnp.sum(probs)) - 1.0) < 1e-5
    assert 0 <= int(act) < A_SIZE
    assert abs(float(log_prob) - float(jnp.log(probs[int(act)]))) < 1e-5

    print("KERNEL_OK")
</pallas_src>

<mosaic_0001>
module attributes {stable_mosaic.version = 11 : i64} {
  func.func @_policy_kernel(%arg0: memref<1x1664xf32, #tpu.memory_space<vmem>>, %arg1: memref<8x1664xf32, #tpu.memory_space<vmem>>, %arg2: memref<8x1xf32, #tpu.memory_space<vmem>>, %arg3: memref<8x128xf32, #tpu.memory_space<vmem>>, %arg4: memref<1x128xf32, #tpu.memory_space<vmem>>, %arg5: memref<1x128xf32, #tpu.memory_space<vmem>>) attributes {dimension_semantics = [], scalar_prefetch = 0 : i64, scratch_operands = 0 : i64, tpu.core_type = #tpu.core_type<tc>} {
    %c0 = arith.constant 0 : index
    %c0_0 = arith.constant 0 : index
    %0 = vector.load %arg0[%c0, %c0_0] : memref<1x1664xf32, #tpu.memory_space<vmem>>, vector<1x1664xf32>
    %c0_1 = arith.constant 0 : index
    %c0_2 = arith.constant 0 : index
    %1 = vector.load %arg1[%c0_1, %c0_2] : memref<8x1664xf32, #tpu.memory_space<vmem>>, vector<8x1664xf32>
    %2 = vector.broadcast %0 : vector<1x1664xf32> to vector<8x1664xf32>
    %3 = arith.mulf %1, %2 : vector<8x1664xf32>
    %cst = arith.constant dense<0.000000e+00> : vector<8xf32>
    %4 = vector.multi_reduction <add>, %3, %cst [1] : vector<8x1664xf32> to vector<8xf32>
    %5 = vector.shape_cast %4 : vector<8xf32> to vector<8x1xf32>
    %c0_3 = arith.constant 0 : index
    %c0_4 = arith.constant 0 : index
    %6 = vector.load %arg2[%c0_3, %c0_4] : memref<8x1xf32, #tpu.memory_space<vmem>>, vector<8x1xf32>
    %7 = arith.addf %5, %6 : vector<8x1xf32>
    %cst_5 = arith.constant 0.000000e+00 : f32
    %8 = vector.broadcast %cst_5 : f32 to vector<8x1xf32>
    %9 = arith.maximumf %7, %8 : vector<8x1xf32>
    %c0_6 = arith.constant 0 : index
    %c0_7 = arith.constant 0 : index
    %10 = vector.load %arg3[%c0_6, %c0_7] : memref<8x128xf32, #tpu.memory_space<vmem>>, vector<8x128xf32>
    %11 = vector.broadcast %9 : vector<8x1xf32> to vector<8x128xf32>
    %12 = arith.mulf %11, %10 : vector<8x128xf32>
    %cst_8 = arith.constant dense<0.000000e+00> : vector<128xf32>
    %13 = vector.multi_reduction <add>, %12, %cst_8 [0] : vector<8x128xf32> to vector<128xf32>
    %14 = vector.shape_cast %13 : vector<128xf32> to vector<1x128xf32>
    %c0_9 = arith.constant 0 : index
    %c0_10 = arith.constant 0 : index
    %15 = vector.load %arg4[%c0_9, %c0_10] : memref<1x128xf32, #tpu.memory_space<vmem>>, vector<1x128xf32>
    %16 = arith.addf %14, %15 : vector<1x128xf32>
    %17 = tpu.iota {dimensions = array<i32: 1>} : vector<1x128xi32>
    %c8_i32 = arith.constant 8 : i32
    %18 = vector.broadcast %c8_i32 : i32 to vector<1x128xi32>
    %19 = arith.cmpi slt, %17, %18 : vector<1x128xi32>
    %cst_11 = arith.constant -1.000000e+30 : f32
    %20 = vector.broadcast %cst_11 : f32 to vector<1x128xf32>
    %21 = arith.select %19, %16, %20 : vector<1x128xi1>, vector<1x128xf32>
    %cst_12 = arith.constant dense<0xFF800000> : vector<1xf32>
    %22 = vector.multi_reduction <maximumf>, %21, %cst_12 [1] : vector<1x128xf32> to vector<1xf32>
    %23 = vector.shape_cast %22 : vector<1xf32> to vector<1x1xf32>
    %24 = vector.broadcast %23 : vector<1x1xf32> to vector<1x128xf32>
    %25 = arith.subf %21, %24 : vector<1x128xf32>
    %26 = math.exp %25 : vector<1x128xf32>
    %cst_13 = arith.constant dense<0.000000e+00> : vector<1xf32>
    %27 = vector.multi_reduction <add>, %26, %cst_13 [1] : vector<1x128xf32> to vector<1xf32>
    %28 = vector.shape_cast %27 : vector<1xf32> to vector<1x1xf32>
    %29 = vector.broadcast %23 : vector<1x1xf32> to vector<1x128xf32>
    %30 = arith.subf %21, %29 : vector<1x128xf32>
    %31 = math.log %28 : vector<1x1xf32>
    %32 = vector.broadcast %31 : vector<1x1xf32> to vector<1x128xf32>
    %33 = arith.subf %30, %32 : vector<1x128xf32>
    %c0_14 = arith.constant 0 : index
    %c0_15 = arith.constant 0 : index
    %34 = vector.load %arg5[%c0_14, %c0_15] : memref<1x128xf32, #tpu.memory_space<vmem>>, vector<1x128xf32>
    tpu.vector_store %arg5[%c0_14, %c0_15], %33 {strides = array<i32>} : memref<1x128xf32, #tpu.memory_space<vmem>>, vector<1x128xf32>,
    return
  }
}

</mosaic_0001>

<bundles_post_ra>
// kernel: simple_policy_forward.1
= control target key start
LH: loop header
LB: loop body
LE: loop exit
PB: predicated region body
PF: predicated region fallthrough
CT: control target
= control target key end

     0   :  { %v37_v0 = vlaneseq  ;;  %v175_v63 = vmov 0   ;;  %vm151_vm1 = vcmask 1040384   ;;  %s265_s0 = inlined_call_operand.vmem [shape: f32[1,1664], index: 0, kind: input, shape index: {}]   ;;  %s266_s1 = inlined_call_operand.vmem [shape: f32[8,1664], index: 1, kind: input, shape index: {}]   ;;  %s267_s2 = inlined_call_operand.vmem [shape: f32[8,1], index: 2, kind: input, shape index: {}]   ;;  %s268_s3 = inlined_call_operand.vmem [shape: f32[8,128], index: 3, kind: input, shape index: {}]   ;;  %s269_s4 = inlined_call_operand.vmem [shape: f32[1,128], index: 4, kind: input, shape index: {}]   ;;  %s270_s5 = inlined_call_operand.vmem [shape: f32[1,128], index: 5, kind: output, shape index: {}]  }
   0x1   :  { %v20_v2 = vld [vmem:[%s265_s0] sm:$0xff]  ;;  %v23_v10 = vld [vmem:[%s266_s1 + $0x8] sm:$0xff]  ;;  %v24_v13 = vld [vmem:[%s266_s1 + $0x10] sm:$0xff]  ;;  %170 = vset.pattern.permute.xlu0 %v175_v63 }
   0x2   :  { %v38_v1 = vshrl.u32 %v37_v0, 7  ;;  %v22_v7 = vld [vmem:[%s266_s1] sm:$0xff]  ;;  %v25_v17 = vld [vmem:[%s266_s1 + $0x18] sm:$0xff]  ;;  %v27_v27 = vld [vmem:[%s266_s1 + $0x28] sm:$0xff] }
   0x3   :  { %v26_v22 = vld [vmem:[%s266_s1 + $0x20] sm:$0xff]  ;;  %v21_v31 = vld [vmem:[%s265_s0 + $0x8] sm:$0x1f]  ;;  %v28_v32 = vld [vmem:[%s266_s1 + $0x30] sm:$0xff] }
   0x4   :  { %v39_v3 = vsub.s32 0, %v38_v1  ;;  %v43_v4 = vsub.s32 1, %v38_v1  ;;  %v47_v5 = vsub.s32 2, %v38_v1  ;;  %v51_v6 = vsub.s32 3, %v38_v1  ;;  %v29_v36 = vld [vmem:[%s266_s1 + $0x38] sm:$0xff]  ;;  %v30_v40 = vld [vmem:[%s266_s1 + $0x40] sm:$0xff] }
   0x5   :  { %v55_v12 = vsub.s32 4, %v38_v1  ;;  %v59_v15 = vsub.s32 5, %v38_v1  ;;  %v63_v20 = vsub.s32 6, %v38_v1  ;;  %v67_v24 = vsub.s32 7, %v38_v1  ;;  %v31_v44 = vld [vmem:[%s266_s1 + $0x48] sm:$0xff]  ;;  %v32_v48 = vld [vmem:[%s266_s1 + $0x50] sm:$0xff] }
   0x6   :  { %v40_v8 = vrot.slane %v20_v2, %v39_v3  ;;  %v44_v9 = vrot.slane %v20_v2, %v43_v4  ;;  %v48_v11 = vrot.slane %v20_v2, %v47_v5  ;;  %v52_v14 = vrot.slane %v20_v2, %v51_v6  ;;  %v33_v52 = vld [vmem:[%s266_s1 + $0x58] sm:$0xff]  ;;  %v34_v56 = vld [vmem:[%s266_s1 + $0x60] sm:$0xff] }
   0x7   :  { %v56_v19 = vrot.slane %v20_v2, %v55_v12  ;;  %v60_v23 = vrot.slane %v20_v2, %v59_v15  ;;  %v64_v28 = vrot.slane %v20_v2, %v63_v20  ;;  %v68_v33 = vrot.slane %v20_v2, %v67_v24  ;;  %v129_v1 = vld [vmem:[%s267_s2] sm:$0xff] }
   0x8   :  { %v102_v16 = vmul.f32 %v40_v8, %v22_v7  ;;  %v103_v18 = vmul.f32 %v44_v9, %v23_v10  ;;  %v104_v21 = vmul.f32 %v48_v11, %v24_v13  ;;  %v105_v25 = vmul.f32 %v52_v14, %v25_v17  ;;  %v145_v14 = vld [vmem:[%s269_s4] sm:$0x1] }
   0x9   :  { %v106_v29 = vmul.f32 %v56_v19, %v26_v22  ;;  %v107_v34 = vmul.f32 %v60_v23, %v27_v27  ;;  %v72_v37 = vrot.slane %v21_v31, %v39_v3  ;;  %v108_v38 = vmul.f32 %v64_v28, %v28_v32 }
   0xa   :  { %v115_v26 = vadd.f32 %v103_v18, %v102_v16  ;;  %v76_v41 = vrot.slane %v21_v31, %v43_v4  ;;  %v109_v42 = vmul.f32 %v68_v33, %v29_v36  ;;  %v80_v45 = vrot.slane %v21_v31, %v47_v5  ;;  %v132_v5 = vld [vmem:[%s268_s3] sm:$0xff] }
   0xb   :  { %v110_v46 = vmul.f32 %v72_v37, %v30_v40  ;;  %v84_v49 = vrot.slane %v21_v31, %v51_v6  ;;  %v88_v53 = vrot.slane %v21_v31, %v55_v12  ;;  %v148_v12 = vand.u32 127, %v37_v0 }
   0xc   :  { %v116_v30 = vadd.f32 %v115_v26, %v104_v21  ;;  %v111_v50 = vmul.f32 %v76_v41, %v31_v44  ;;  %v112_v54 = vmul.f32 %v80_v45, %v32_v48 }
   0xd   :  { %v113_v57 = vmul.f32 %v84_v49, %v33_v52  ;;  %v114_v59 = vmul.f32 %v88_v53, %v34_v56  ;;  %vm149_vm0 = vcmp.lt.s32.totalorder %v148_v12, 8 }
   0xe   :  { %v117_v35 = vadd.f32 %v116_v30, %v105_v25 }
  0x10   :  { %v118_v39 = vadd.f32 %v117_v35, %v106_v29 }
  0x12   :  { %v119_v43 = vadd.f32 %v118_v39, %v107_v34 }
  0x14   :  { %v120_v47 = vadd.f32 %v119_v43, %v108_v38 }
  0x16   :  { %v121_v51 = vadd.f32 %v120_v47, %v109_v42 }
  0x18   :  { %v122_v55 = vadd.f32 %v121_v51, %v110_v46 }
  0x1a   :  { %v123_v58 = vadd.f32 %v122_v55, %v111_v50 }
  0x1c   :  { %v124_v60 = vadd.f32 %v123_v58, %v112_v54 }
  0x1e   :  { %v125_v61 = vadd.f32 %v124_v60, %v113_v57 }
  0x20   :  { %v126_v62 = vadd.f32 %v125_v61, %v114_v59 }
  0x22   :  { %127 = vadd.xlane.f32.xlu0 %v126_v62 }
  0xaf   :  { %v128_v2 = vpop.xlane.xlu0 %127 }
  0xb0   :  { %v130_v3 = vadd.f32 %v129_v1, %v128_v2 }
  0xb2   :  { %v131_v4 = vmax.f32 %v130_v3, 0.0 }
  0xb4   :  { %135 = vperm.xlu0 %170, %v131_v4  }
 0x133   :  { %v136_v6 = vpop.permute.xlu0 %135 }
 0x134   :  { %v138_v7 = vmul.f32 %v136_v6, %v132_v5 }
 0x136   :  { %v139_v8 = vrot.slane %v138_v7, 4 }
 0x138   :  { %v140_v9 = vadd.f32 %v139_v8, %v138_v7 }
 0x13a   :  { %v141_v10 = vrot.slane %v140_v9, 2 }
 0x13c   :  { %v142_v11 = vadd.f32 %v141_v10, %v140_v9 }
 0x13e   :  { %v143_v13 = vrot.slane %v142_v11, 1 }
 0x140   :  { %v144_v15 = vadd.f32 %v143_v13, %v142_v11 }
 0x142   :  { %v146_v16 = vadd.f32 %v145_v14, %v144_v15 }
 0x144   :  { %v150_v17 = vsel %vm149_vm0, %v146_v16, -1e+30 }
 0x145   :  { %v152_v18 = vsel %vm151_vm1, %v150_v17, -inf }
 0x146   :  { %153 = vmax.xlane.f32.xlu1 %v152_v18 }
 0x1d3   :  { %v154_v19 = vpop.xlane.xlu1 %153 }
 0x1d4   :  { %v155_v20 = vsub.f32 %v150_v17, %v154_v19 }
 0x1d6   :  { %v156_v21 = vmul.f32 1.442695, %v155_v20 }
 0x1d8   :  { %171 = vpow2.f32 %v156_v21 }
 0x1e2   :  { %v172_v22 = vpop.eup %171 }
 0x1e3   :  { %v158_v23 = vsel %vm151_vm1, %v172_v22, 0.0 }
 0x1e4   :  { %159 = vadd.xlane.f32.xlu1 %v158_v23 }
 0x271   :  { %v160_v0 = vpop.xlane.xlu1 %159 }
 0x272   :  { %173 = vlog2.f32 %v160_v0 }
 0x27c   :  { %v174_v24 = vpop.eup %173 }
 0x27d   :  { %v162_v25 = vmul.f32 0.6931472, %v174_v24 }
 0x27f   :  { %v163_v26 = vsub.f32 %v155_v20, %v162_v25 }
 0x281   :  { %164 = vst [vmem:[%s270_s5] sm:$0x1] %v163_v26 }

</bundles_post_ra>
